<compile_context>
chip_gen: v6e
topology: v6e:2x2x1
jax: 0.10.0
libtpu: 0.0.40
codegen_flags: <defaults>
</compile_context>

<pallas_src>
import jax
import jax.numpy as jnp
import numpy as np
from jax.experimental import pallas as pl
from jax.experimental.pallas import tpu as pltpu


def _conv_bn_relu6_kernel(p_ref, w_ref, shift_ref, o_ref):
    # p_ref:     (NB, K, TM)      im2col patches for NB images (K = C_in*KH*KW, TM = M tile)
    # w_ref:     (C_out, K)       conv weight with eval-mode BN scale folded in
    # shift_ref: (C_out, 1)       folded BN shift = beta - mean*scale (f32)
    # o_ref:     (NB, C_out, TM)  output block: lane-dense (TM % 128 == 0) and NCHW-flat
    w = w_ref[...]
    shift = shift_ref[...]
    nb = p_ref.shape[0]
    for b in range(nb):  # NB is a small compile-time constant (VMEM-budgeted)
        y = jnp.dot(w, p_ref[b], preferred_element_type=jnp.float32)   # (C_out, TM), f32 acc
        o_ref[b] = jnp.clip(y + shift, 0.0, 6.0).astype(o_ref.dtype)   # fused BN shift + ReLU6


def _pick_m_tile(m_dim: int, max_tile: int = 2048) -> int:
    """Largest multiple of 128 that divides m_dim (<= max_tile) -> lane-dense stores."""
    if m_dim % 128 != 0:
        # TODO(synk): pad M to a multiple of 128 at production sizes instead of full-extent.
        return m_dim
    best, cand = 128, 128
    while cand <= min(m_dim, max_tile):
        if m_dim % cand == 0:
            best = cand
        cand += 128
    return best


def _pick_batch_block(n, k_dim, c_out, tm, in_bytes, out_bytes,
                      budget_bytes=20 * 1024 * 1024) -> int:
    """Largest divisor of n whose double-buffered blocks stay under the VMEM budget."""
    per_img = 2 * tm * (k_dim * in_bytes + c_out * out_bytes)   # double-buffered p + out
    fixed = 2 * c_out * (k_dim * in_bytes + 4)                  # weight + shift blocks
    nb = 1
    for cand in range(1, n + 1):
        if n % cand == 0 and cand * per_img + fixed <= budget_bytes:
            nb = cand
    return nb


def conv_bn_relu6(x_nchw, weight, gamma, beta, running_mean, running_var,
                  *, stride=1, padding=1, dilation=1, groups=1, eps=1e-5,
                  compute_dtype=jnp.bfloat16, out_dtype=jnp.float32):
    """Fused Conv2d(bias=False) -> BatchNorm2d(eval) -> ReLU6.

    x_nchw: (N, C_in, H, W); weight: (C_out, C_in, KH, KW) (PyTorch layout).
    compute_dtype: MXU input dtype for patches/weights (bf16 default; accumulation is
    always f32).  out_dtype: dtype of the returned activation (bf16 also fine downstream).
    """
    assert groups == 1  # TODO(synk): grouped conv not implemented.

    n, c_in, h, w = x_nchw.shape
    c_out, _, kh, kw = weight.shape
    h_out = (h + 2 * padding - dilation * (kh - 1) - 1) // stride + 1
    w_out = (w + 2 * padding - dilation * (kw - 1) - 1) // stride + 1
    k_dim = c_in * kh * kw
    m_dim = h_out * w_out

    # ---- wrapper-side im2col + BN folding -----------------------------------
    # One fused XLA op; cast to compute_dtype *first* so the expanded array lives in
    # HBM at half width.  Patch feature order is (C_in, KH, KW).
    p = jax.lax.conv_general_dilated_patches(
        x_nchw.astype(compute_dtype),
        filter_shape=(kh, kw),
        window_strides=(stride, stride),
        padding=((padding, padding), (padding, padding)),
        rhs_dilation=(dilation, dilation),
        dimension_numbers=("NCHW", "OIHW", "NCHW"),
    ).reshape(n, k_dim, m_dim)                                  # (N, K, M)

    # Fold eval-mode BatchNorm into the conv weight (scale) + a shift vector.
    scale = gamma / jnp.sqrt(running_var + eps)                 # (C_out,)
    shift = beta - running_mean * scale                         # (C_out,)
    w2d = (weight.reshape(c_out, k_dim) * scale[:, None]).astype(compute_dtype)
    shift_col = shift.reshape(c_out, 1).astype(jnp.float32)

    # ---- tiling: (batch-block, M-tile) grid, both axes parallel --------------
    in_bytes = jnp.dtype(compute_dtype).itemsize
    out_bytes = jnp.dtype(out_dtype).itemsize
    tm = _pick_m_tile(m_dim)
    nb = _pick_batch_block(n, k_dim, c_out, tm, in_bytes, out_bytes)
    grid = (n // nb, m_dim // tm)

    flops = 2 * n * c_out * k_dim * m_dim
    bytes_accessed = (p.size * in_bytes + w2d.size * in_bytes
                      + shift_col.size * 4 + n * c_out * m_dim * out_bytes)

    out = pl.pallas_call(
        _conv_bn_relu6_kernel,
        out_shape=jax.ShapeDtypeStruct((n, c_out, m_dim), out_dtype),
        grid_spec=pltpu.PrefetchScalarGridSpec(
            num_scalar_prefetch=0,
            grid=grid,
            in_specs=[
                pl.BlockSpec((nb, k_dim, tm), lambda b, m: (b, 0, m)),
                pl.BlockSpec((c_out, k_dim), lambda b, m: (0, 0)),
                pl.BlockSpec((c_out, 1), lambda b, m: (0, 0)),
            ],
            out_specs=pl.BlockSpec((nb, c_out, tm), lambda b, m: (b, 0, m)),
        ),
        compiler_params=pltpu.CompilerParams(
            dimension_semantics=("parallel", "parallel"),
            vmem_limit_bytes=32 * 1024 * 1024),
        cost_estimate=pl.CostEstimate(
            flops=flops, transcendentals=0, bytes_accessed=int(bytes_accessed)),
    )(p, w2d, shift_col)

    # (N, C_out, H_out*W_out) -> (N, C_out, H_out, W_out): already NCHW, no transpose.
    return out.reshape(n, c_out, h_out, w_out)


def _reference(x_nchw, weight, gamma, beta, running_mean, running_var,
               *, stride=1, padding=1, eps=1e-5):
    y = jax.lax.conv_general_dilated(
        x_nchw, weight,
        window_strides=(stride, stride),
        padding=((padding, padding), (padding, padding)),
        dimension_numbers=("NCHW", "OIHW", "NCHW"))
    scale = (gamma / jnp.sqrt(running_var + eps)).reshape(1, -1, 1, 1)
    shift = (beta - running_mean * gamma / jnp.sqrt(running_var + eps)).reshape(1, -1, 1, 1)
    return jnp.clip(y * scale + shift, 0.0, 6.0)


if __name__ == "__main__":
    # Module config: ConvBNReLU6(c_in=4, c_out=8, kernel_size=3, stride=1, padding=1)
    N, C_IN, H, W = 2, 4, 16, 16
    C_OUT, KH, KW = 8, 3, 3

    key = jax.random.PRNGKey(0)
    kx, kw_, kg, kb, km, kv = jax.random.split(key, 6)

    x = jax.random.normal(kx, (N, C_IN, H, W), jnp.float32)
    # Conv2d weight (bias=False per BIAS flag).
    weight = jax.random.normal(kw_, (C_OUT, C_IN, KH, KW), jnp.float32) * 0.1
    # BatchNorm2d parameters / running stats (deterministic, non-trivial).
    gamma = 1.0 + 0.1 * jax.random.normal(kg, (C_OUT,), jnp.float32)
    beta = 0.1 * jax.random.normal(kb, (C_OUT,), jnp.float32)
    running_mean = 0.1 * jax.random.normal(km, (C_OUT,), jnp.float32)
    running_var = jnp.abs(1.0 + 0.1 * jax.random.normal(kv, (C_OUT,), jnp.float32))

    out = conv_bn_relu6(x, weight, gamma, beta, running_mean, running_var,
                        stride=1, padding=1)
    out = jax.block_until_ready(out)

    ref = _reference(x, weight, gamma, beta, running_mean, running_var,
                     stride=1, padding=1)
    # bf16 MXU inputs (f32 accumulation) -> slightly loosened tolerance vs f32 reference.
    np.testing.assert_allclose(np.asarray(out), np.asarray(ref), rtol=2e-2, atol=2e-2)

    print("KERNEL_OK")
</pallas_src>

<mosaic_0001>
module attributes {stable_mosaic.version = 11 : i64} {
  func.func @_conv_bn_relu6_kernel(%arg0: i32, %arg1: i32, %arg2: memref<2x36x256xbf16, #tpu.memory_space<vmem>>, %arg3: memref<8x36xbf16, #tpu.memory_space<vmem>>, %arg4: memref<8x1xf32, #tpu.memory_space<vmem>>, %arg5: memref<2x8x256xf32, #tpu.memory_space<vmem>>) attributes {dimension_semantics = [#tpu.dimension_semantics<parallel>, #tpu.dimension_semantics<parallel>], iteration_bounds = array<i64: 1, 1>, scalar_prefetch = 0 : i64, scratch_operands = 0 : i64, tpu.core_type = #tpu.core_type<tc>, window_params = [{transform_indices = @transform_0, window_bounds = array<i64: 2, 36, 256>}, {pipeline_mode = #tpu.pipeline_mode<synchronous>, transform_indices = @transform_1, window_bounds = array<i64: 8, 36>}, {pipeline_mode = #tpu.pipeline_mode<synchronous>, transform_indices = @transform_2, window_bounds = array<i64: 8, 1>}, {transform_indices = @transform_3, window_bounds = array<i64: 2, 8, 256>}]} {
    %c0 = arith.constant 0 : index
    %c0_0 = arith.constant 0 : index
    %0 = vector.load %arg3[%c0, %c0_0] : memref<8x36xbf16, #tpu.memory_space<vmem>>, vector<8x36xbf16>
    %c0_1 = arith.constant 0 : index
    %c0_2 = arith.constant 0 : index
    %1 = vector.load %arg4[%c0_1, %c0_2] : memref<8x1xf32, #tpu.memory_space<vmem>>, vector<8x1xf32>
    %c0_3 = arith.constant 0 : index
    %c0_4 = arith.constant 0 : index
    %c0_5 = arith.constant 0 : index
    %2 = vector.load %arg2[%c0_3, %c0_4, %c0_5] : memref<2x36x256xbf16, #tpu.memory_space<vmem>>, vector<1x36x256xbf16>
    %3 = vector.shape_cast %2 : vector<1x36x256xbf16> to vector<36x256xbf16>
    %cst = arith.constant dense<0.000000e+00> : vector<8x256xf32>
    %4 = tpu.matmul %0, %3, %cst {dimension_numbers = #tpu.dot_dimension_numbers<[1], [0], [0], [1], [0, 0, 1, 1], [], []>} : vector<8x36xbf16>, vector<36x256xbf16>, vector<8x256xf32> -> vector<8x256xf32>
    %5 = vector.broadcast %1 : vector<8x1xf32> to vector<8x256xf32>
    %6 = arith.addf %4, %5 : vector<8x256xf32>
    %cst_6 = arith.constant 0.000000e+00 : f32
    %cst_7 = arith.constant 6.000000e+00 : f32
    %7 = vector.broadcast %cst_6 : f32 to vector<8x256xf32>
    %8 = arith.maximumf %7, %6 : vector<8x256xf32>
    %9 = vector.broadcast %cst_7 : f32 to vector<8x256xf32>
    %10 = arith.minimumf %9, %8 : vector<8x256xf32>
    %c0_8 = arith.constant 0 : index
    %c0_9 = arith.constant 0 : index
    %c0_10 = arith.constant 0 : index
    %11 = vector.load %arg5[%c0_8, %c0_9, %c0_10] : memref<2x8x256xf32, #tpu.memory_space<vmem>>, vector<1x8x256xf32>
    %12 = vector.shape_cast %11 : vector<1x8x256xf32> to vector<8x256xf32>
    %13 = vector.shape_cast %10 : vector<8x256xf32> to vector<1x8x256xf32>
    tpu.vector_store %arg5[%c0_8, %c0_9, %c0_10], %13 {strides = array<i32>} : memref<2x8x256xf32, #tpu.memory_space<vmem>>, vector<1x8x256xf32>,
    %c1 = arith.constant 1 : index
    %c0_11 = arith.constant 0 : index
    %c0_12 = arith.constant 0 : index
    %14 = vector.load %arg2[%c1, %c0_11, %c0_12] : memref<2x36x256xbf16, #tpu.memory_space<vmem>>, vector<1x36x256xbf16>
    %15 = vector.shape_cast %14 : vector<1x36x256xbf16> to vector<36x256xbf16>
    %cst_13 = arith.constant dense<0.000000e+00> : vector<8x256xf32>
    %16 = tpu.matmul %0, %15, %cst_13 {dimension_numbers = #tpu.dot_dimension_numbers<[1], [0], [0], [1], [0, 0, 1, 1], [], []>} : vector<8x36xbf16>, vector<36x256xbf16>, vector<8x256xf32> -> vector<8x256xf32>
    %17 = vector.broadcast %1 : vector<8x1xf32> to vector<8x256xf32>
    %18 = arith.addf %16, %17 : vector<8x256xf32>
    %cst_14 = arith.constant 0.000000e+00 : f32
    %cst_15 = arith.constant 6.000000e+00 : f32
    %19 = vector.broadcast %cst_14 : f32 to vector<8x256xf32>
    %20 = arith.maximumf %19, %18 : vector<8x256xf32>
    %21 = vector.broadcast %cst_15 : f32 to vector<8x256xf32>
    %22 = arith.minimumf %21, %20 : vector<8x256xf32>
    %c1_16 = arith.constant 1 : index
    %c0_17 = arith.constant 0 : index
    %c0_18 = arith.constant 0 : index
    %23 = vector.load %arg5[%c1_16, %c0_17, %c0_18] : memref<2x8x256xf32, #tpu.memory_space<vmem>>, vector<1x8x256xf32>
    %24 = vector.shape_cast %23 : vector<1x8x256xf32> to vector<8x256xf32>
    %25 = vector.shape_cast %22 : vector<8x256xf32> to vector<1x8x256xf32>
    tpu.vector_store %arg5[%c1_16, %c0_17, %c0_18], %25 {strides = array<i32>} : memref<2x8x256xf32, #tpu.memory_space<vmem>>, vector<1x8x256xf32>,
    return
  }
  func.func @transform_0(%arg0: i32, %arg1: i32) -> (i32, i32, i32) {
    %c0_i32 = arith.constant 0 : i32
    %c0_i32_0 = arith.constant 0 : i32
    return %arg0, %c0_i32, %arg1 : i32, i32, i32
  }
  func.func @transform_1(%arg0: i32, %arg1: i32) -> (i32, i32) {
    %c0_i32 = arith.constant 0 : i32
    %c0_i32_0 = arith.constant 0 : i32
    %c0_i32_1 = arith.constant 0 : i32
    return %c0_i32, %c0_i32_0 : i32, i32
  }
  func.func @transform_2(%arg0: i32, %arg1: i32) -> (i32, i32) {
    %c0_i32 = arith.constant 0 : i32
    %c0_i32_0 = arith.constant 0 : i32
    %c0_i32_1 = arith.constant 0 : i32
    return %c0_i32, %c0_i32_0 : i32, i32
  }
  func.func @transform_3(%arg0: i32, %arg1: i32) -> (i32, i32, i32) {
    %c0_i32 = arith.constant 0 : i32
    %c0_i32_0 = arith.constant 0 : i32
    return %arg0, %c0_i32, %arg1 : i32, i32, i32
  }
}

</mosaic_0001>

<bundles_post_ra>
// kernel: tpu_custom_call.1
= control target key start
LH: loop header
LB: loop body
LE: loop exit
PB: predicated region body
PF: predicated region fallthrough
CT: control target
= control target key end

     0   :  { %vm57_vm0 = vcmask 1041408   ;;  %v276_v14 = vmov 0   ;;  %s339_s0 = inlined_call_operand.vmem [shape: bf16[2,36,256], index: 0, kind: input, shape index: {}]   ;;  %s340_s1 = inlined_call_operand.vmem [shape: bf16[8,36], index: 1, kind: input, shape index: {}]   ;;  %s341_s2 = inlined_call_operand.vmem [shape: f32[8,1], index: 2, kind: input, shape index: {}]   ;;  %s342_s3 = inlined_call_operand.hbm [shape: f32[2,8,256], index: 3, kind: output, shape index: {}]  }
   0x1   :  { %v22_v0 = vld [vmem:[%s339_s0 + $0x20] sm:$0x33]  ;;  %v224_v1 = vld [vmem:[%s339_s0 + $0x48] sm:$0x33]  ;;  %v242_v6 = vld [vmem:[%s339_s0 + $0x14] ss:$8 sps:$4 sm:$0xff]   ;;  %96 = vmatprep.mubr.bf16.mxu0 %v276_v14  ;;  %180 = vmatprep.mubr.bf16.mxu1 %v276_v14 }
   0x2   :  { %v217_v2 = vcombine.high %v22_v0, %v22_v0  ;;  %v230_v3 = vcombine.high %v224_v1, %v224_v1  ;;  %v216_v4 = vcombine.low %v22_v0, %v22_v0  ;;  %v229_v5 = vcombine.low %v224_v1, %v224_v1  ;;  %v244_v7 = vld [vmem:[%s339_s0 + $0x3c] ss:$8 sps:$4 sm:$0xff]   ;;  %v246_v8 = vld [vmem:[%s339_s0 + $0x10] ss:$8 sps:$4 sm:$0xff]   ;;  %v250_v13 = vld [vmem:[%s339_s0 + $0x2c] ss:$8 sps:$4 sm:$0xff]  }
   0x3   :  { %v247_v11 = vld [vmem:[%s339_s0 + $0x38] ss:$8 sps:$4 sm:$0xff]   ;;  %v248_v12 = vld [vmem:[%s339_s0 + $0x4] ss:$8 sps:$4 sm:$0xff]  }
   0x4   :  { %218 = vmatprep.subr.msk.bf16.mxu0 %vm57_vm0, %v217_v2  ;;  %231 = vmatprep.subr.msk.bf16.mxu1 %vm57_vm0, %v230_v3  ;;  %v59_v9 = vsel %vm57_vm0, %v216_v4, 0  ;;  %v143_v10 = vsel %vm57_vm0, %v229_v5, 0 }
   0x5   :  { %75 = vmatpush1.bf16.msra.mxu0 %v59_v9  ;;  %159 = vmatpush1.bf16.msra.mxu1 %v143_v10 }
   0x6   :  { %76 = vmatprep.subr.bf16.mxu0 %v242_v6  ;;  %160 = vmatprep.subr.bf16.mxu1 %v244_v7 }
   0x7   :  { %8 = vsyncpa [#allocation3], 0  ;;  %237 = vset.pattern.permute.xlu0 %v276_v14  ;;  %v17_v15 = vld [vmem:[%s341_s2] sm:$0xff]  ;;  %v253_v17 = vld [vmem:[%s339_s0 + $0x28] ss:$8 sps:$4 sm:$0xff]   ;;  %vm53_vm1 = vcmask 293888  }
   0x8   :  { %v252_v16 = vld [vmem:[%s339_s0] ss:$8 sps:$4 sm:$0xff]   ;;  %25 = vperm.xlu0 %237, %v17_v15   ;;  %s277_s0 = smov [#allocation2]  }
   0x9   :  { %77 = vmatpush1.bf16.msra.mxu0 %v246_v8  ;;  %161 = vmatpush1.bf16.msra.mxu1 %v247_v11  ;;  %v16_v18 = vld [vmem:[%s340_s1] sm:$0xf]  ;;  %s201_s2 = sshll.u32 %s277_s0, 4  ;;  %s202_s2 = int_to_ptr.vmem [resolvable:$true] %s201_s2 }
   0xa   :  { %78 = vmatprep.subr.bf16.mxu0 %v248_v12  ;;  %162 = vmatprep.subr.bf16.mxu1 %v250_v13  ;;  %s254_s1 = scalar_lea.vmem %s202_s2, 512  ;;  %p259_p1 = scmp.lt.s32.totalorder %s202_s2, %s202_s2 }
   0xb   :  { %p255_p0 = scmp.ne.s32.totalorder %s202_s2, %s254_s1  ;;  %p260_p2 = scmp.lt.s32.totalorder %s254_s1, %s254_s1 }
   0xd   :  { %79 = vmatpush1.bf16.msra.mxu0 %v252_v16  ;;  %163 = vmatpush1.bf16.msra.mxu1 %v253_v17  ;;  %p261_p3 = por %p260_p2, %p259_p1 }
   0xf   :  { %p262_p4 = pnand %p261_p3, %p255_p0 }
  0x10   :  { %219 = vmatmul.mubr.msk.bf16.vlgmr.msra.gmra.mxu0 %vm53_vm1, %v16_v18  ;;  %232 = vmatmul.mubr.msk.bf16.vlgmr.msra.gmra.mxu1 %vm53_vm1, %v16_v18 }
  0x83   :  { %v26_v19 = vpop.permute.xlu0 %25 }
  0xd0   :  { %v98_v20 = vpop.f32.mrf.mxu0  ;;  %v182_v21 = vpop.f32.mrf.mxu1 }
  0xd1   :  { %v99_v22 = vadd.f32 %v98_v20, %v26_v19  ;;  %v183_v23 = vadd.f32 %v182_v21, %v26_v19 }
  0xd2   :  { %v100_v24 = vpop.f32.mrf.mxu0  ;;  %v184_v25 = vpop.f32.mrf.mxu1 }
  0xd3   :  { %v105_v26 = vmax.f32 %v99_v22, 0.0  ;;  %v189_v27 = vmax.f32 %v183_v23, 0.0  ;;  %v101_v28 = vadd.f32 %v100_v24, %v26_v19  ;;  %v185_v29 = vadd.f32 %v184_v25, %v26_v19 }
  0xd4   :  { %v102_v30 = vpop.f32.mrf.mxu0  ;;  %v186_v31 = vpop.f32.mrf.mxu1 }
  0xd5   :  { %v107_v32 = vmin.f32 %v105_v26, 6.0  ;;  %v191_v33 = vmin.f32 %v189_v27, 6.0  ;;  %v106_v34 = vmax.f32 %v101_v28, 0.0  ;;  %v190_v35 = vmax.f32 %v185_v29, 0.0 }
  0xd6   :  { %v103_v36 = vpop.f32.mrf.mxu0  ;;  %v187_v37 = vpop.f32.mrf.mxu1 }
  0xd7   :  { %109 = vst [vmem:[#allocation2] sm:$0xff] %v107_v32  ;;  %194 = vst [vmem:[#allocation2 + $0x10] sm:$0xff] %v191_v33  ;;  %v108_v38 = vmin.f32 %v106_v34, 6.0  ;;  %v192_v39 = vmin.f32 %v190_v35, 6.0 }
  0xd9   :  { %110 = vst [vmem:[#allocation2 + $0x8] sm:$0xff] %v108_v38  ;;  %195 = vst [vmem:[#allocation2 + $0x18] sm:$0xff] %v192_v39 }
  0xda   :  { %265 = shalt.err (!%p262_p4)
}
  0xdb   :  { %s278_s9 = smov 256   ;;  %s279_s10 = smov 16  }
  0xdc   :  { %207 = dma.vmem_to_hbm [thread:$0]  %s202_s2, 512, %s342_s3, [#allocation3], %s278_s9, %s278_s9, %s279_s10  }
  0xdd   :  { %274 = dma.done.wait [#allocation3], 512  }
  0xde   :  { %275 = vsyncadd [#allocation3], 4294966784 }
  0xdf   :  { %211 = vsyncpa [#allocation3], 1 }

</bundles_post_ra>
